<compile_context>
chip_gen: v7x
topology: tpu7x:2x2x1
jax: 0.10.0
libtpu: 0.0.40
codegen_flags: <defaults>
</compile_context>

<pallas_src>
import jax
import jax.numpy as jnp
from jax.experimental import pallas as pl
from jax.experimental.pallas import tpu as pltpu

LANES = 128
SUBLANES = 8
CHUNK = SUBLANES * LANES   # 1024 elements = one (8,128) f32 vreg tile
MAX_TILE_R = 4096          # 4096*128*4B = 2 MiB / input block (3 in x 2 buf = 12 MiB)


def _default_core_splits():
    """2-way 'parallel' grid split only helps on multi-TC chips (v7x)."""
    try:
        kind = jax.devices()[0].device_kind.lower()
    except Exception:
        return 1
    return 2 if "v7" in kind else 1


def _make_mrel_kernel(tile_r, total_blocks, needs_gate):
    """tile_r / total_blocks / needs_gate are static Python values."""
    rgroups = tile_r // SUBLANES

    def kernel(fake_ref, real_ref, mask_ref, num_out_ref, den_out_ref,
               num_acc, den_acc):
        k = pl.program_id(1)
        nk = pl.num_programs(1)

        @pl.when(k == 0)
        def _():
            num_acc[...] = jnp.zeros_like(num_acc)
            den_acc[...] = jnp.zeros_like(den_acc)

        def accumulate():
            f = fake_ref[...].astype(jnp.float32)
            r = real_ref[...].astype(jnp.float32)
            m = mask_ref[...].astype(jnp.float32)

            # torch: sum(mask * (|fake-real| * mask) / (real + 1e-6))
            inv = pl.reciprocal(r + 1e-6, approx=False)   # EUP slot, exact
            num_term = (m * m) * jnp.abs(f - r) * inv

            # Layout-preserving split of the sublane-major dim: pure vreg adds,
            # no per-step cross-sublane XLU reduce, no tiny masked stores.
            num_acc[...] += jnp.sum(
                num_term.reshape(rgroups, SUBLANES, LANES), axis=0)
            den_acc[...] += jnp.sum(
                m.reshape(rgroups, SUBLANES, LANES), axis=0)

        if needs_gate:
            # Only emitted when the parallel split overhangs: skip the clamped
            # duplicate block so it isn't double-counted.
            pl.when(pl.program_id(0) * nk + k < total_blocks)(accumulate)
        else:
            accumulate()

        @pl.when(k == nk - 1)
        def _():
            num_out_ref[...] = num_acc[...]
            den_out_ref[...] = den_acc[...]

    return kernel


def _mrel_pallas_partial(f2, r2, m2, tile_r, blocks):
    """Returns (num, den) partial sums over the first blocks*tile_r rows."""
    splits = min(_default_core_splits(), blocks)
    k_blocks = -(-blocks // splits)
    needs_gate = splits * k_blocks != blocks
    grid = (splits, k_blocks)

    if needs_gate:
        def in_map(p, k):
            # Clamp the (rare) overhanging block on the last core; its
            # contribution is skipped by the in-kernel pl.when gate.
            return (jnp.minimum(p * k_blocks + k, blocks - 1), 0)
    else:
        def in_map(p, k):
            return (p * k_blocks + k, 0)

    in_spec = pl.BlockSpec((tile_r, LANES), in_map)
    out_spec = pl.BlockSpec((SUBLANES, LANES), lambda p, k: (p, 0))
    out_shape = jax.ShapeDtypeStruct((splits * SUBLANES, LANES), jnp.float32)

    num_part, den_part = pl.pallas_call(
        _make_mrel_kernel(tile_r, blocks, needs_gate),
        out_shape=(out_shape, out_shape),
        grid_spec=pltpu.PrefetchScalarGridSpec(
            num_scalar_prefetch=0,
            grid=grid,
            in_specs=[in_spec, in_spec, in_spec],
            out_specs=[out_spec, out_spec],
            scratch_shapes=[
                pltpu.VMEM((SUBLANES, LANES), jnp.float32),
                pltpu.VMEM((SUBLANES, LANES), jnp.float32),
            ],
        ),
        compiler_params=pltpu.CompilerParams(
            dimension_semantics=("parallel", "arbitrary"),
            vmem_limit_bytes=32 * 1024 * 1024,
        ),
    )(f2, r2, m2)

    return jnp.sum(num_part), jnp.sum(den_part)


def mrel_loss(fake, real, mask):
    """Pallas implementation of MREL.forward(fake, real, mask)."""
    if fake.shape != real.shape:
        # TODO(synk): F.upsample(mode='bilinear') behaves like
        # align_corners=False (matches jax.image.resize); confirm the original
        # model did not rely on align_corners=True.
        _, _, H, W = real.shape
        fake = jax.image.resize(fake, fake.shape[:2] + (H, W), method="bilinear")

    n = int(fake.size)
    f_flat = fake.reshape(-1)
    r_flat = real.reshape(-1)
    m_flat = mask.reshape(-1)

    num = jnp.float32(0.0)
    den = jnp.float32(0.0)

    rows8 = (n // CHUNK) * SUBLANES     # rows in complete (8,128) chunks
    n_kernel = 0
    if rows8 > 0:
        tile_r = min(MAX_TILE_R, rows8)            # multiple of 8
        blocks = rows8 // tile_r                   # whole tile_r-row blocks
        rows_kernel = blocks * tile_r
        n_kernel = rows_kernel * LANES

        if n % LANES == 0:
            # Free reshape of the full array; the grid only touches the first
            # rows_kernel rows, so no pad / prefix-slice copies and no OOB.
            rows_all = n // LANES
            f2 = f_flat.reshape(rows_all, LANES)
            r2 = r_flat.reshape(rows_all, LANES)
            m2 = m_flat.reshape(rows_all, LANES)
        else:
            # Non lane-aligned tail: pay one prefix slice per input (rare).
            f2 = f_flat[:n_kernel].reshape(rows_kernel, LANES)
            r2 = r_flat[:n_kernel].reshape(rows_kernel, LANES)
            m2 = m_flat[:n_kernel].reshape(rows_kernel, LANES)

        num_k, den_k = _mrel_pallas_partial(f2, r2, m2, tile_r, blocks)
        num = num + num_k
        den = den + den_k

    if n_kernel < n:
        # Small leftover (< tile_r*128 + 1024 elements): plain-jnp reduction.
        ft = f_flat[n_kernel:].astype(jnp.float32)
        rt = r_flat[n_kernel:].astype(jnp.float32)
        mt = m_flat[n_kernel:].astype(jnp.float32)
        num = num + jnp.sum(mt * mt * jnp.abs(ft - rt) / (rt + 1e-6))
        den = den + jnp.sum(mt)

    return (num / (den + 1e-6)).astype(jnp.float32)


def _mrel_ref(fake, real, mask):
    if fake.shape != real.shape:
        _, _, H, W = real.shape
        fake = jax.image.resize(fake, fake.shape[:2] + (H, W), method="bilinear")
    diff = jnp.abs(fake - real) * mask
    return jnp.sum(mask * (diff / (real + 1e-6))) / (jnp.sum(mask) + 1e-6)


if __name__ == "__main__":
    key = jax.random.PRNGKey(0)
    k1, k2, k3 = jax.random.split(key, 3)

    # Aligned case (2*4*16*16 = 2048 elements -> kernel only, no tail).
    fake = jax.random.normal(k1, (2, 4, 16, 16), dtype=jnp.float32)
    real = jax.random.uniform(k2, (2, 4, 16, 16), dtype=jnp.float32) + 0.5
    mask = (jax.random.uniform(k3, (2, 4, 16, 16)) > 0.5).astype(jnp.float32)

    loss = jax.block_until_ready(mrel_loss(fake, real, mask))
    ref = jax.block_until_ready(_mrel_ref(fake, real, mask))
    assert jnp.allclose(loss, ref, rtol=1e-5, atol=1e-6), (loss, ref)

    # Ragged case (2*4*15*16 = 1920 elements -> kernel prefix + jnp tail).
    k4, k5, k6 = jax.random.split(k1, 3)
    fake2 = jax.random.normal(k4, (2, 4, 15, 16), dtype=jnp.float32)
    real2 = jax.random.uniform(k5, (2, 4, 15, 16), dtype=jnp.float32) + 0.5
    mask2 = (jax.random.uniform(k6, (2, 4, 15, 16)) > 0.5).astype(jnp.float32)

    loss2 = jax.block_until_ready(mrel_loss(fake2, real2, mask2))
    ref2 = jax.block_until_ready(_mrel_ref(fake2, real2, mask2))
    assert jnp.allclose(loss2, ref2, rtol=1e-5, atol=1e-6), (loss2, ref2)

    print("KERNEL_OK")
</pallas_src>

<mosaic_0001>
module attributes {stable_mosaic.version = 11 : i64} {
  func.func @kernel(%arg0: i32, %arg1: i32, %arg2: memref<16x128xf32, #tpu.memory_space<vmem>>, %arg3: memref<16x128xf32, #tpu.memory_space<vmem>>, %arg4: memref<16x128xf32, #tpu.memory_space<vmem>>, %arg5: memref<8x128xf32, #tpu.memory_space<vmem>>, %arg6: memref<8x128xf32, #tpu.memory_space<vmem>>, %arg7: memref<8x128xf32, #tpu.memory_space<vmem>>, %arg8: memref<8x128xf32, #tpu.memory_space<vmem>>) attributes {dimension_semantics = [#tpu.dimension_semantics<parallel>, #tpu.dimension_semantics<arbitrary>], iteration_bounds = array<i64: 1, 1>, scalar_prefetch = 0 : i64, scratch_operands = 2 : i64, tpu.core_type = #tpu.core_type<tc>, window_params = [{transform_indices = @transform_0, window_bounds = array<i64: 16, 128>}, {transform_indices = @transform_1, window_bounds = array<i64: 16, 128>}, {transform_indices = @transform_2, window_bounds = array<i64: 16, 128>}, {transform_indices = @transform_3, window_bounds = array<i64: 8, 128>}, {transform_indices = @transform_4, window_bounds = array<i64: 8, 128>}]} {
    %c0_i32 = arith.constant 0 : i32
    %0 = arith.cmpi eq, %arg1, %c0_i32 : i32
    %1 = arith.extui %0 : i1 to i32
    %c0_i32_0 = arith.constant 0 : i32
    %2 = arith.cmpi ne, %1, %c0_i32_0 : i32
    scf.if %2 {
      %cst_18 = arith.constant 0.000000e+00 : f32
      %27 = vector.broadcast %cst_18 : f32 to vector<8x128xf32>
      %c0_19 = arith.constant 0 : index
      %c0_20 = arith.constant 0 : index
      %28 = vector.load %arg7[%c0_19, %c0_20] : memref<8x128xf32, #tpu.memory_space<vmem>>, vector<8x128xf32>
      tpu.vector_store %arg7[%c0_19, %c0_20], %27 {strides = array<i32>} : memref<8x128xf32, #tpu.memory_space<vmem>>, vector<8x128xf32>,
      %cst_21 = arith.constant 0.000000e+00 : f32
      %29 = vector.broadcast %cst_21 : f32 to vector<8x128xf32>
      %c0_22 = arith.constant 0 : index
      %c0_23 = arith.constant 0 : index
      %30 = vector.load %arg8[%c0_22, %c0_23] : memref<8x128xf32, #tpu.memory_space<vmem>>, vector<8x128xf32>
      tpu.vector_store %arg8[%c0_22, %c0_23], %29 {strides = array<i32>} : memref<8x128xf32, #tpu.memory_space<vmem>>, vector<8x128xf32>,
    } else {
    }
    %c0 = arith.constant 0 : index
    %c0_1 = arith.constant 0 : index
    %3 = vector.load %arg2[%c0, %c0_1] : memref<16x128xf32, #tpu.memory_space<vmem>>, vector<16x128xf32>
    %c0_2 = arith.constant 0 : index
    %c0_3 = arith.constant 0 : index
    %4 = vector.load %arg3[%c0_2, %c0_3] : memref<16x128xf32, #tpu.memory_space<vmem>>, vector<16x128xf32>
    %c0_4 = arith.constant 0 : index
    %c0_5 = arith.constant 0 : index
    %5 = vector.load %arg4[%c0_4, %c0_5] : memref<16x128xf32, #tpu.memory_space<vmem>>, vector<16x128xf32>
    %cst = arith.constant 9.99999997E-7 : f32
    %6 = vector.broadcast %cst : f32 to vector<16x128xf32>
    %7 = arith.addf %4, %6 : vector<16x128xf32>
    %8 = tpu.reciprocal %7 : vector<16x128xf32> -> vector<16x128xf32>
    %9 = arith.mulf %5, %5 : vector<16x128xf32>
    %10 = arith.subf %3, %4 : vector<16x128xf32>
    %11 = math.absf %10 : vector<16x128xf32>
    %12 = arith.mulf %9, %11 : vector<16x128xf32>
    %13 = arith.mulf %12, %8 : vector<16x128xf32>
    %c0_6 = arith.constant 0 : index
    %c0_7 = arith.constant 0 : index
    %14 = vector.load %arg7[%c0_6, %c0_7] : memref<8x128xf32, #tpu.memory_space<vmem>>, vector<8x128xf32>
    %15 = vector.shape_cast %13 : vector<16x128xf32> to vector<2x8x128xf32>
    %cst_8 = arith.constant dense<0.000000e+00> : vector<8x128xf32>
    %16 = vector.multi_reduction <add>, %15, %cst_8 [0] : vector<2x8x128xf32> to vector<8x128xf32>
    %17 = arith.addf %14, %16 : vector<8x128xf32>
    %c0_9 = arith.constant 0 : index
    %c0_10 = arith.constant 0 : index
    %18 = vector.load %arg7[%c0_9, %c0_10] : memref<8x128xf32, #tpu.memory_space<vmem>>, vector<8x128xf32>
    tpu.vector_store %arg7[%c0_9, %c0_10], %17 {strides = array<i32>} : memref<8x128xf32, #tpu.memory_space<vmem>>, vector<8x128xf32>,
    %c0_11 = arith.constant 0 : index
    %c0_12 = arith.constant 0 : index
    %19 = vector.load %arg8[%c0_11, %c0_12] : memref<8x128xf32, #tpu.memory_space<vmem>>, vector<8x128xf32>
    %20 = vector.shape_cast %5 : vector<16x128xf32> to vector<2x8x128xf32>
    %cst_13 = arith.constant dense<0.000000e+00> : vector<8x128xf32>
    %21 = vector.multi_reduction <add>, %20, %cst_13 [0] : vector<2x8x128xf32> to vector<8x128xf32>
    %22 = arith.addf %19, %21 : vector<8x128xf32>
    %c0_14 = arith.constant 0 : index
    %c0_15 = arith.constant 0 : index
    %23 = vector.load %arg8[%c0_14, %c0_15] : memref<8x128xf32, #tpu.memory_space<vmem>>, vector<8x128xf32>
    tpu.vector_store %arg8[%c0_14, %c0_15], %22 {strides = array<i32>} : memref<8x128xf32, #tpu.memory_space<vmem>>, vector<8x128xf32>,
    %c0_i32_16 = arith.constant 0 : i32
    %24 = arith.cmpi eq, %arg1, %c0_i32_16 : i32
    %25 = arith.extui %24 : i1 to i32
    %c0_i32_17 = arith.constant 0 : i32
    %26 = arith.cmpi ne, %25, %c0_i32_17 : i32
    scf.if %26 {
      %c0_18 = arith.constant 0 : index
      %c0_19 = arith.constant 0 : index
      %27 = vector.load %arg7[%c0_18, %c0_19] : memref<8x128xf32, #tpu.memory_space<vmem>>, vector<8x128xf32>
      %c0_20 = arith.constant 0 : index
      %c0_21 = arith.constant 0 : index
      %28 = vector.load %arg5[%c0_20, %c0_21] : memref<8x128xf32, #tpu.memory_space<vmem>>, vector<8x128xf32>
      tpu.vector_store %arg5[%c0_20, %c0_21], %27 {strides = array<i32>} : memref<8x128xf32, #tpu.memory_space<vmem>>, vector<8x128xf32>,
      %c0_22 = arith.constant 0 : index
      %c0_23 = arith.constant 0 : index
      %29 = vector.load %arg8[%c0_22, %c0_23] : memref<8x128xf32, #tpu.memory_space<vmem>>, vector<8x128xf32>
      %c0_24 = arith.constant 0 : index
      %c0_25 = arith.constant 0 : index
      %30 = vector.load %arg6[%c0_24, %c0_25] : memref<8x128xf32, #tpu.memory_space<vmem>>, vector<8x128xf32>
      tpu.vector_store %arg6[%c0_24, %c0_25], %29 {strides = array<i32>} : memref<8x128xf32, #tpu.memory_space<vmem>>, vector<8x128xf32>,
    } else {
    }
    return
  }
  func.func @transform_0(%arg0: i32, %arg1: i32) -> (i32, i32) {
    %c1_i32 = arith.constant 1 : i32
    %0 = arith.muli %arg0, %c1_i32 : i32
    %1 = arith.addi %0, %arg1 : i32
    %c0_i32 = arith.constant 0 : i32
    %c0_i32_0 = arith.constant 0 : i32
    return %1, %c0_i32 : i32, i32
  }
  func.func @transform_1(%arg0: i32, %arg1: i32) -> (i32, i32) {
    %c1_i32 = arith.constant 1 : i32
    %0 = arith.muli %arg0, %c1_i32 : i32
    %1 = arith.addi %0, %arg1 : i32
    %c0_i32 = arith.constant 0 : i32
    %c0_i32_0 = arith.constant 0 : i32
    return %1, %c0_i32 : i32, i32
  }
  func.func @transform_2(%arg0: i32, %arg1: i32) -> (i32, i32) {
    %c1_i32 = arith.constant 1 : i32
    %0 = arith.muli %arg0, %c1_i32 : i32
    %1 = arith.addi %0, %arg1 : i32
    %c0_i32 = arith.constant 0 : i32
    %c0_i32_0 = arith.constant 0 : i32
    return %1, %c0_i32 : i32, i32
  }
  func.func @transform_3(%arg0: i32, %arg1: i32) -> (i32, i32) {
    %c0_i32 = arith.constant 0 : i32
    %c0_i32_0 = arith.constant 0 : i32
    return %arg0, %c0_i32 : i32, i32
  }
  func.func @transform_4(%arg0: i32, %arg1: i32) -> (i32, i32) {
    %c0_i32 = arith.constant 0 : i32
    %c0_i32_0 = arith.constant 0 : i32
    return %arg0, %c0_i32 : i32, i32
  }
}

</mosaic_0001>

<bundles_post_ra>
// kernel: tpu_custom_call.1
= control target key start
LH: loop header
LB: loop body
LE: loop exit
PB: predicated region body
PF: predicated region fallthrough
CT: control target
= control target key end

     0   :  { %10 = vsyncpa [#allocation5], 0  ;;  %s385_s0 = inlined_call_operand.hbm [shape: f32[16,128], index: 0, kind: input, shape index: {}]   ;;  %s386_s1 = inlined_call_operand.hbm [shape: f32[16,128], index: 1, kind: input, shape index: {}]   ;;  %s387_s2 = inlined_call_operand.hbm [shape: f32[16,128], index: 2, kind: input, shape index: {}]   ;;  %s388_s3 = inlined_call_operand.hbm [shape: f32[8,128], index: 3, kind: output, shape index: {0}]   ;;  %s389_s4 = inlined_call_operand.hbm [shape: f32[8,128], index: 4, kind: output, shape index: {1}]  }
   0x1   :  { %11 = vsyncpa [#allocation8], 0 }
   0x2   :  { %12 = vsyncpa [#allocation6], 0 }
   0x3   :  { %13 = vsyncpa [#allocation12], 0  ;;  %s277_s15 = smov [#allocation7]   ;;  %s278_s17 = smov [#allocation4]  }
   0x4   :  { %s39_s16 = sshll.u32 %s277_s15, 4  ;;  %s23_s18 = sshll.u32 %s278_s17, 4  ;;  %s40_s16 = int_to_ptr.vmem [resolvable:$true] %s39_s16  ;;  %s309_s18 = int_to_ptr.vmem [resolvable:$true] %s23_s18 }
   0x5   :  { %s159_s21 = scalar_lea.hbm %s386_s1, 256 }
   0x6   :  { %p160_p0 = scmp.ne.s32.totalorder %s386_s1, %s159_s21  ;;  %p163_p1 = scmp.lt.u32.totalorder %s159_s21, %s386_s1 }
   0x8   :  { %p165_p2 = pnand %p163_p1, %p160_p0 }
   0xa   :  { %168 = shalt.err (!%p165_p2)
}
   0xb   :  { %s169_s26 = scalar_lea.vmem %s40_s16, 256  ;;  %p174_p4 = scmp.lt.s32.totalorder %s40_s16, %s40_s16 }
   0xc   :  { %p170_p3 = scmp.ne.s32.totalorder %s40_s16, %s169_s26  ;;  %p175_p5 = scmp.lt.s32.totalorder %s169_s26, %s169_s26 }
   0xe   :  { %p176_p6 = por %p175_p5, %p174_p4 }
  0x10   :  { %p177_p7 = pnand %p176_p6, %p170_p3 }
  0x12   :  { %180 = shalt.err (!%p177_p7)
}
  0x13   :  { %s279_s27 = smov 128   ;;  %s280_s28 = smov 8  }
  0x14   :  { %45 = dma.hbm_to_vmem [thread:$0]  %s386_s1, 256, %s40_s16, [#allocation8], %s279_s27, %s279_s27, %s280_s28  }
  0x15   :  { %s181_s7 = scalar_lea.hbm %s385_s0, 256 }
  0x16   :  { %p182_p8 = scmp.ne.s32.totalorder %s385_s0, %s181_s7  ;;  %p185_p9 = scmp.lt.u32.totalorder %s181_s7, %s385_s0 }
  0x18   :  { %p187_p10 = pnand %p185_p9, %p182_p8 }
  0x1a   :  { %190 = shalt.err (!%p187_p10)
}
  0x1b   :  { %s191_s12 = scalar_lea.vmem %s309_s18, 256  ;;  %p196_p12 = scmp.lt.s32.totalorder %s309_s18, %s309_s18 }
  0x1c   :  { %p192_p11 = scmp.ne.s32.totalorder %s309_s18, %s191_s12  ;;  %p197_p13 = scmp.lt.s32.totalorder %s191_s12, %s191_s12 }
  0x1e   :  { %p198_p0 = por %p197_p13, %p196_p12 }
  0x20   :  { %p199_p1 = pnand %p198_p0, %p192_p11 }
  0x22   :  { %202 = shalt.err (!%p199_p1)
}
  0x23   :  { %29 = dma.hbm_to_vmem [thread:$0]  %s385_s0, 256, %s309_s18, [#allocation5], %s279_s27, %s279_s27, %s280_s28  }
  0x24   :  { %s281_s14 = smov [#allocation9]   ;;  %s203_s19 = scalar_lea.hbm %s387_s2, 256 }
  0x25   :  { %s55_s15 = sshll.u32 %s281_s14, 4  ;;  %p204_p2 = scmp.ne.s32.totalorder %s387_s2, %s203_s19  ;;  %s56_s15 = int_to_ptr.vmem [resolvable:$true] %s55_s15 }
  0x26   :  { %p207_p3 = scmp.lt.u32.totalorder %s203_s19, %s387_s2 }
  0x28   :  { %p209_p4 = pnand %p207_p3, %p204_p2 }
  0x2a   :  { %212 = shalt.err (!%p209_p4)
}
  0x2b   :  { %s213_s24 = scalar_lea.vmem %s56_s15, 256  ;;  %p218_p6 = scmp.lt.s32.totalorder %s56_s15, %s56_s15 }
  0x2c   :  { %p214_p5 = scmp.ne.s32.totalorder %s56_s15, %s213_s24  ;;  %p219_p7 = scmp.lt.s32.totalorder %s213_s24, %s213_s24 }
  0x2e   :  { %p220_p8 = por %p219_p7, %p218_p6 }
  0x30   :  { %p221_p9 = pnand %p220_p8, %p214_p5 }
  0x32   :  { %224 = shalt.err (!%p221_p9)
}
  0x33   :  { %61 = dma.hbm_to_vmem [thread:$0]  %s387_s2, 256, %s56_s15, [#allocation8], %s279_s27, %s279_s27, %s280_s28  }
  0x34   :  { %269 = dma.done.wait [#allocation5], 256  }
  0x35   :  { %270 = vsyncadd [#allocation5], 4294967040 }
  0x36   :  { %271 = dma.done.wait [#allocation8], 512  }
  0x37   :  { %272 = vsyncadd [#allocation8], 4294966784  ;;  %v83_v0 = vld [vmem:[#allocation4] sm:$0xff]  ;;  %v84_v1 = vld [vmem:[#allocation4 + $0x8] sm:$0xff]  ;;  %s282_s25 = smov [#allocation11]  }
  0x38   :  { %v85_v2 = vld [vmem:[#allocation7] sm:$0xff]  ;;  %s134_s26 = sshll.u32 %s282_s25, 4  ;;  %v86_v3 = vld [vmem:[#allocation7 + $0x8] sm:$0xff]  ;;  %v87_v5 = vld [vmem:[#allocation9] sm:$0xff]  ;;  %s135_s26 = int_to_ptr.vmem [resolvable:$true] %s134_s26 }
  0x39   :  { %v89_v4 = vadd.f32 1e-06, %v85_v2  ;;  %v88_v6 = vld [vmem:[#allocation9 + $0x8] sm:$0xff]  ;;  %v90_v7 = vadd.f32 1e-06, %v86_v3  ;;  %v95_v8 = vsub.f32 %v83_v0, %v85_v2  ;;  %v96_v9 = vsub.f32 %v84_v1, %v86_v3  ;;  %s225_s2 = scalar_lea.vmem %s135_s26, 128  ;;  %p230_p11 = scmp.lt.s32.totalorder %s135_s26, %s135_s26 }
  0x3a   :  { %v108_v10 = vadd.f32 %v88_v6, %v87_v5  ;;  %v93_v11 = vmul.f32 %v87_v5, %v87_v5  ;;  %p226_p10 = scmp.ne.s32.totalorder %s135_s26, %s225_s2  ;;  %p231_p12 = scmp.lt.s32.totalorder %s225_s2, %s225_s2 }
  0x3b   :  { %155 = vrcp.f32 %v89_v4  ;;  %v97_v12 = vand.u32 2147483647, %v95_v8 }
  0x3c   :  { %157 = vrcp.f32 %v90_v7  ;;  %117 = vst [vmem:[#allocation11] sm:$0xff] %v108_v10  ;;  %p232_p13 = por %p231_p12, %p230_p11 }
  0x3e   :  { %p233_p0 = pnand %p232_p13, %p226_p10 }
  0x40   :  { %236 = shalt.err (!%p233_p0)
}
  0x41   :  { %s237_s29 = scalar_lea.hbm %s389_s4, 128 }
  0x42   :  { %p238_p1 = scmp.ne.s32.totalorder %s389_s4, %s237_s29  ;;  %p241_p2 = scmp.lt.u32.totalorder %s237_s29, %s389_s4 }
  0x44   :  { %p243_p3 = pnand %p241_p2, %p238_p1 }
  0x46   :  { %246 = shalt.err (!%p243_p3)
}
  0x47   :  { %137 = dma.vmem_to_hbm [thread:$0]  %s135_s26, 128, %s389_s4, [#allocation12]   ;;  %v94_v13 = vmul.f32 %v88_v6, %v88_v6  ;;  %v98_v14 = vand.u32 2147483647, %v96_v9  ;;  %v99_v15 = vmul.f32 %v97_v12, %v93_v11  ;;  %v156_v17 = vpop.eup %155 }
  0x48   :  { %v158_v18 = vpop.eup %157  ;;  %s283_s10 = smov [#allocation10]  }
  0x49   :  { %v100_v16 = vmul.f32 %v98_v14, %v94_v13  ;;  %v101_v19 = vmul.f32 %v156_v17, %v99_v15  ;;  %s124_s11 = sshll.u32 %s283_s10, 4  ;;  %s125_s11 = int_to_ptr.vmem [resolvable:$true] %s124_s11 }
  0x4a   :  { %s247_s12 = scalar_lea.vmem %s125_s11, 128  ;;  %p252_p5 = scmp.lt.s32.totalorder %s125_s11, %s125_s11 }
  0x4b   :  { %v102_v20 = vmul.f32 %v158_v18, %v100_v16  ;;  %p248_p4 = scmp.ne.s32.totalorder %s125_s11, %s247_s12  ;;  %p253_p6 = scmp.lt.s32.totalorder %s247_s12, %s247_s12 }
  0x4d   :  { %v104_v21 = vadd.f32 %v102_v20, %v101_v19  ;;  %p254_p7 = por %p253_p6, %p252_p5 }
  0x4f   :  { %115 = vst [vmem:[#allocation10] sm:$0xff] %v104_v21  ;;  %p255_p8 = pnand %p254_p7, %p248_p4 }
  0x51   :  { %258 = shalt.err (!%p255_p8)
}
  0x52   :  { %s259_s13 = scalar_lea.hbm %s388_s3, 128 }
  0x53   :  { %p260_p9 = scmp.ne.s32.totalorder %s388_s3, %s259_s13  ;;  %p263_p10 = scmp.lt.u32.totalorder %s259_s13, %s388_s3 }
  0x55   :  { %p265_p11 = pnand %p263_p10, %p260_p9 }
  0x57   :  { %268 = shalt.err (!%p265_p11)
}
  0x58   :  { %127 = dma.vmem_to_hbm [thread:$0]  %s125_s11, 128, %s388_s3, [#allocation6]  }
  0x59   :  { %273 = dma.done.wait [#allocation6], 128  }
  0x5a   :  { %274 = vsyncadd [#allocation6], 4294967168 }
  0x5b   :  { %275 = dma.done.wait [#allocation12], 128  }
  0x5c   :  { %276 = vsyncadd [#allocation12], 4294967168 }
  0x5d   :  { %144 = vsyncpa [#allocation5], 1 }
  0x5e   :  { %145 = vsyncpa [#allocation8], 1 }
  0x5f   :  { %146 = vsyncpa [#allocation6], 1 }
  0x60   :  { %147 = vsyncpa [#allocation12], 1 }

</bundles_post_ra>
